<compile_context>
chip_gen: v5e
topology: v5e:2x2
jax: 0.10.0
libtpu: 0.0.40
codegen_flags: <defaults>
</compile_context>

<pallas_src>
import functools
import numpy as np
import jax
import jax.numpy as jnp
from jax.experimental import pallas as pl
from jax.experimental.pallas import tpu as pltpu

C1 = 32   # conv1 output channels (fixed by the module)
C2 = 64   # conv2 output channels (fixed by the module)


# ------------------------------ Pallas kernel --------------------------------
def _encoder_kernel(p1_ref, w1_ref, w2_ref, b2_ref, w3_ref, b3_ref,
                    o_ref, s_ref, *, rows, bases, tail):
    """Fused conv1+ReLU -> conv2+ReLU -> conv3 for one block of images."""
    # Zero the small scratch tail that the shifted conv2 windows of the last
    # image may read (the [0:rows] region is fully overwritten below).
    s_ref[rows:rows + tail, :] = jnp.zeros((tail, 4 * C1), s_ref.dtype)

    # conv1 (+bias via ones-column) + ReLU: one matmul over every image and
    # every parity-packed output cell of this grid step.  The result is the
    # conv1 activation in space-to-depth layout (128 lanes) -> one full-lane
    # store into the VMEM scratch.
    h1 = jnp.dot(p1_ref[...], w1_ref[...], preferred_element_type=jnp.float32)
    s_ref[0:rows, :] = jnp.maximum(h1, 0.0).astype(s_ref.dtype)

    # conv2 patches: four unit-stride, 128-lane shifted windows of the scratch
    # concatenated at 128-lane boundaries -> (rows, 512) bf16 patch matrix.
    patch2 = jnp.concatenate([s_ref[b:b + rows, :] for b in bases], axis=-1)

    # conv2 + ReLU and conv3 (1x1), each a single matmul over all rows.
    h2 = jnp.dot(patch2, w2_ref[...], preferred_element_type=jnp.float32)
    h2 = jnp.maximum(h2 + b2_ref[...], 0.0).astype(jnp.bfloat16)
    y = jnp.dot(h2, w3_ref[...], preferred_element_type=jnp.float32)
    # Single lane-dense (128-wide) store of the whole step's output.
    o_ref[...] = (y + b3_ref[...]).astype(o_ref.dtype)


# ------------------------------- JAX wrapper ----------------------------------
@jax.jit
def encoder_forward(x_nchw, params):
    w1, b1, w2, b2, w3, b3 = params
    N, Cin, H, W = x_nchw.shape
    assert H % 4 == 0 and W % 4 == 0, "this kernel assumes H, W divisible by 4"
    latent = w3.shape[0]

    H1, W1 = H // 2, W // 2            # conv1 output spatial
    H2, W2 = H1 // 2, W1 // 2          # conv2/conv3 output spatial
    A, Bw = H2 + 1, W2 + 1             # extended space-to-depth cell grid
    R = A * Bw                         # cells per image
    R_pad = -(-R // 8) * 8             # sublane-aligned rows per image
    K1 = 9 * Cin + 1                   # conv1 patch (9 taps * Cin) + bias col
    K_in = -(-(4 * K1) // 128) * 128   # lane-padded conv1 contraction dim
    LANE_OUT = -(-latent // 128) * 128 # lane-dense output width

    # images per grid step: push matmul M (= b_img * R_pad) toward ~256.
    # (With 2 TensorCores per chip on v7x, N >= 2*b_img keeps both cores busy.)
    b_img = max(1, min(N, -(-256 // R_pad)))
    while N % b_img:
        b_img -= 1
    steps = N // b_img
    rows = b_img * R_pad
    bases = (0, 1, Bw, Bw + 1)                 # conv2 cell-window row offsets
    tail = -(-(Bw + 1) // 8) * 8               # scratch rows past `rows`

    # -------- wrapper-side layout (conv1 im2col, parity-packed) ---------------
    # TODO(synk): for large images fold this packing into the kernel's DMA via
    # scalar-prefetch index maps instead of materializing it in HBM.
    xh = jnp.transpose(x_nchw, (0, 2, 3, 1)).astype(jnp.float32)     # NHWC
    xp = jnp.pad(xh, ((0, 0), (1, 1), (1, 1), (0, 0)))
    taps = [xp[:, dy:dy + 2 * H1:2, dx:dx + 2 * W1:2, :]
            for dy in range(3) for dx in range(3)]
    P = jnp.concatenate(taps + [jnp.ones((N, H1, W1, 1), jnp.float32)], axis=-1)
    # parity groups of the zero-padded conv1 output grid -> extended cells
    g0 = jnp.pad(P[:, 1::2, 1::2, :], ((0, 0), (1, 0), (1, 0), (0, 0)))
    g1 = jnp.pad(P[:, 1::2, 0::2, :], ((0, 0), (1, 0), (0, 1), (0, 0)))
    g2 = jnp.pad(P[:, 0::2, 1::2, :], ((0, 0), (0, 1), (1, 0), (0, 0)))
    g3 = jnp.pad(P[:, 0::2, 0::2, :], ((0, 0), (0, 1), (0, 1), (0, 0)))
    E = jnp.stack([g0, g1, g2, g3], axis=3).reshape(N, R, 4 * K1)
    E = jnp.pad(E, ((0, 0), (0, R_pad - R), (0, K_in - 4 * K1)))
    p1 = E.reshape(N * R_pad, K_in)

    # -------- weights as lane-dense (K, Cout) matrices for the MXU ------------
    w1m = jnp.transpose(w1, (2, 3, 1, 0)).reshape(9 * Cin, C1)        # (27, 32)
    w1m = jnp.concatenate([w1m, b1.reshape(1, C1)], axis=0)           # (K1, 32)
    w1blk = jnp.kron(jnp.eye(4, dtype=jnp.float32), w1m)              # (4K1,128)
    w1blk = jnp.pad(w1blk, ((0, K_in - 4 * K1), (0, 0)))              # (K_in,128)

    w2t = jnp.transpose(w2, (2, 3, 1, 0))                             # (3,3,C1,C2)
    w2e = jnp.zeros((4 * 4 * C1, C2), jnp.float32)
    for dy2 in range(2):
        for dx2 in range(2):
            for py in range(2):
                for px in range(2):
                    ty, tx = 2 * dy2 + py, 2 * dx2 + px
                    if ty < 3 and tx < 3:
                        r = (2 * dy2 + dx2) * (4 * C1) + (2 * py + px) * C1
                        w2e = w2e.at[r:r + C1, :].set(w2t[ty, tx])
    w2e = w2e.astype(jnp.bfloat16)                                    # (512, 64)

    w3e = jnp.zeros((C2, LANE_OUT), jnp.float32).at[:, :latent].set(
        jnp.transpose(w3[:, :, 0, 0], (1, 0))).astype(jnp.bfloat16)   # (64, 128)
    b2r = b2.reshape(1, C2).astype(jnp.float32)
    b3e = jnp.zeros((1, LANE_OUT), jnp.float32).at[0, :latent].set(b3)

    kernel = functools.partial(_encoder_kernel, rows=rows, bases=bases, tail=tail)
    out = pl.pallas_call(
        kernel,
        out_shape=jax.ShapeDtypeStruct((N * R_pad, LANE_OUT), jnp.float32),
        grid=(steps,),
        in_specs=[
            pl.BlockSpec((rows, K_in), lambda n: (n, 0)),
            pl.BlockSpec((K_in, 4 * C1), lambda n: (0, 0)),
            pl.BlockSpec((4 * 4 * C1, C2), lambda n: (0, 0)),
            pl.BlockSpec((1, C2), lambda n: (0, 0)),
            pl.BlockSpec((C2, LANE_OUT), lambda n: (0, 0)),
            pl.BlockSpec((1, LANE_OUT), lambda n: (0, 0)),
        ],
        out_specs=pl.BlockSpec((rows, LANE_OUT), lambda n: (n, 0)),
        scratch_shapes=[pltpu.VMEM((rows + tail, 4 * C1), jnp.bfloat16)],
        compiler_params=pltpu.CompilerParams(
            dimension_semantics=("parallel",)),
    )(p1, w1blk, w2e, b2r, w3e, b3e)

    # Drop padded lanes / extended-grid garbage rows, back to NCHW.
    y = out.reshape(N, R_pad, LANE_OUT)[:, :R, :latent]
    y = y.reshape(N, A, Bw, latent)[:, :H2, :W2, :]
    return jnp.transpose(y, (0, 3, 1, 2))


# ----------------------------- Parameter init ---------------------------------
def init_encoder_params(key, in_dim=3, latent_dim=16):
    """Deterministic synthetic params, same shapes/init-style as nn.Conv2d."""
    ks = jax.random.split(key, 6)

    def conv_init(kw_key, kb_key, cout, cin, kh, kw):
        fan_in = cin * kh * kw
        bound = 1.0 / np.sqrt(fan_in)
        w = jax.random.uniform(kw_key, (cout, cin, kh, kw), jnp.float32, -bound, bound)
        b = jax.random.uniform(kb_key, (cout,), jnp.float32, -bound, bound)
        return w, b

    w1, b1 = conv_init(ks[0], ks[1], C1, in_dim, 3, 3)
    w2, b2 = conv_init(ks[2], ks[3], C2, C1, 3, 3)
    w3, b3 = conv_init(ks[4], ks[5], latent_dim, C2, 1, 1)
    return (w1, b1, w2, b2, w3, b3)


# ------------------------------ f32 reference ---------------------------------
def encoder_reference(x_nchw, params):
    """Pure-JAX reference (lax conv, f32) for correctness checking."""
    w1, b1, w2, b2, w3, b3 = params

    def conv(x, w, b, stride, pad):
        y = jax.lax.conv_general_dilated(
            x, w, (stride, stride), [(pad, pad), (pad, pad)],
            dimension_numbers=("NCHW", "OIHW", "NCHW"))
        return y + b[None, :, None, None]

    h = jax.nn.relu(conv(x_nchw, w1, b1, 2, 1))
    h = jax.nn.relu(conv(h, w2, b2, 2, 1))
    return conv(h, w3, b3, 1, 0)


# ---------------------------------- main ---------------------------------------
if __name__ == "__main__":
    key = jax.random.PRNGKey(0)
    k_params, k_x = jax.random.split(key)

    in_dim, latent_dim = 3, 16
    params = init_encoder_params(k_params, in_dim=in_dim, latent_dim=latent_dim)

    # Small input consistent with the module: NCHW = (2, 3, 16, 16)
    x = jax.random.normal(k_x, (2, in_dim, 16, 16), dtype=jnp.float32)

    out = jax.block_until_ready(encoder_forward(x, params))
    ref = jax.block_until_ready(encoder_reference(x, params))

    assert out.shape == (2, latent_dim, 4, 4), out.shape
    # conv1 in f32, conv2/conv3 with bf16 MXU inputs (f32 accumulation) vs. the
    # f32 reference -> loosened tolerance.
    max_err = float(np.max(np.abs(np.asarray(out) - np.asarray(ref))))
    assert np.allclose(np.asarray(out), np.asarray(ref), rtol=2e-2, atol=3e-2), max_err

    print("KERNEL_OK")
</pallas_src>

<mosaic_0001>
module attributes {stable_mosaic.version = 11 : i64} {
  func.func @_encoder_kernel(%arg0: i32, %arg1: memref<64x128xf32, #tpu.memory_space<vmem>>, %arg2: memref<128x128xf32, #tpu.memory_space<vmem>>, %arg3: memref<512x64xbf16, #tpu.memory_space<vmem>>, %arg4: memref<1x64xf32, #tpu.memory_space<vmem>>, %arg5: memref<64x128xbf16, #tpu.memory_space<vmem>>, %arg6: memref<1x128xf32, #tpu.memory_space<vmem>>, %arg7: memref<64x128xf32, #tpu.memory_space<vmem>>, %arg8: memref<72x128xbf16, #tpu.memory_space<vmem>>) attributes {dimension_semantics = [#tpu.dimension_semantics<parallel>], iteration_bounds = array<i64: 1>, scalar_prefetch = 0 : i64, scratch_operands = 1 : i64, tpu.core_type = #tpu.core_type<tc>, window_params = [{transform_indices = @transform_0, window_bounds = array<i64: 64, 128>}, {pipeline_mode = #tpu.pipeline_mode<synchronous>, transform_indices = @transform_1, window_bounds = array<i64: 128, 128>}, {pipeline_mode = #tpu.pipeline_mode<synchronous>, transform_indices = @transform_2, window_bounds = array<i64: 512, 64>}, {pipeline_mode = #tpu.pipeline_mode<synchronous>, transform_indices = @transform_3, window_bounds = array<i64: 1, 64>}, {pipeline_mode = #tpu.pipeline_mode<synchronous>, transform_indices = @transform_4, window_bounds = array<i64: 64, 128>}, {pipeline_mode = #tpu.pipeline_mode<synchronous>, transform_indices = @transform_5, window_bounds = array<i64: 1, 128>}, {transform_indices = @transform_6, window_bounds = array<i64: 64, 128>}]} {
    %cst = arith.constant 0.000000e+00 : bf16
    %0 = vector.broadcast %cst : bf16 to vector<8x128xbf16>
    %c64 = arith.constant 64 : index
    %c0 = arith.constant 0 : index
    %1 = vector.load %arg8[%c64, %c0] : memref<72x128xbf16, #tpu.memory_space<vmem>>, vector<8x128xbf16>
    tpu.vector_store %arg8[%c64, %c0], %0 {strides = array<i32>} : memref<72x128xbf16, #tpu.memory_space<vmem>>, vector<8x128xbf16>,
    %c0_0 = arith.constant 0 : index
    %c0_1 = arith.constant 0 : index
    %2 = vector.load %arg1[%c0_0, %c0_1] : memref<64x128xf32, #tpu.memory_space<vmem>>, vector<64x128xf32>
    %c0_2 = arith.constant 0 : index
    %c0_3 = arith.constant 0 : index
    %3 = vector.load %arg2[%c0_2, %c0_3] : memref<128x128xf32, #tpu.memory_space<vmem>>, vector<128x128xf32>
    %cst_4 = arith.constant dense<0.000000e+00> : vector<64x128xf32>
    %4 = tpu.matmul %2, %3, %cst_4 {dimension_numbers = #tpu.dot_dimension_numbers<[1], [0], [0], [1], [0, 0, 1, 1], [], []>} : vector<64x128xf32>, vector<128x128xf32>, vector<64x128xf32> -> vector<64x128xf32>
    %cst_5 = arith.constant 0.000000e+00 : f32
    %5 = vector.broadcast %cst_5 : f32 to vector<64x128xf32>
    %6 = arith.maximumf %4, %5 : vector<64x128xf32>
    %7 = arith.truncf %6 : vector<64x128xf32> to vector<64x128xbf16>
    %c0_6 = arith.constant 0 : index
    %c0_7 = arith.constant 0 : index
    %8 = vector.load %arg8[%c0_6, %c0_7] : memref<72x128xbf16, #tpu.memory_space<vmem>>, vector<64x128xbf16>
    tpu.vector_store %arg8[%c0_6, %c0_7], %7 {strides = array<i32>} : memref<72x128xbf16, #tpu.memory_space<vmem>>, vector<64x128xbf16>,
    %c0_8 = arith.constant 0 : index
    %c0_9 = arith.constant 0 : index
    %9 = vector.load %arg8[%c0_8, %c0_9] : memref<72x128xbf16, #tpu.memory_space<vmem>>, vector<64x128xbf16>
    %c1 = arith.constant 1 : index
    %c0_10 = arith.constant 0 : index
    %10 = vector.load %arg8[%c1, %c0_10] : memref<72x128xbf16, #tpu.memory_space<vmem>>, vector<64x128xbf16>
    %c5 = arith.constant 5 : index
    %c0_11 = arith.constant 0 : index
    %11 = vector.load %arg8[%c5, %c0_11] : memref<72x128xbf16, #tpu.memory_space<vmem>>, vector<64x128xbf16>
    %c6 = arith.constant 6 : index
    %c0_12 = arith.constant 0 : index
    %12 = vector.load %arg8[%c6, %c0_12] : memref<72x128xbf16, #tpu.memory_space<vmem>>, vector<64x128xbf16>
    %13 = tpu.concatenate %9, %10, %11, %12 in 1 : vector<64x128xbf16>, vector<64x128xbf16>, vector<64x128xbf16>, vector<64x128xbf16> -> vector<64x512xbf16>
    %c0_13 = arith.constant 0 : index
    %c0_14 = arith.constant 0 : index
    %14 = vector.load %arg3[%c0_13, %c0_14] : memref<512x64xbf16, #tpu.memory_space<vmem>>, vector<512x64xbf16>
    %cst_15 = arith.constant dense<0.000000e+00> : vector<64x64xf32>
    %15 = tpu.matmul %13, %14, %cst_15 {dimension_numbers = #tpu.dot_dimension_numbers<[1], [0], [0], [1], [0, 0, 1, 1], [], []>} : vector<64x512xbf16>, vector<512x64xbf16>, vector<64x64xf32> -> vector<64x64xf32>
    %c0_16 = arith.constant 0 : index
    %c0_17 = arith.constant 0 : index
    %16 = vector.load %arg4[%c0_16, %c0_17] : memref<1x64xf32, #tpu.memory_space<vmem>>, vector<1x64xf32>
    %17 = vector.broadcast %16 : vector<1x64xf32> to vector<64x64xf32>
    %18 = arith.addf %15, %17 : vector<64x64xf32>
    %cst_18 = arith.constant 0.000000e+00 : f32
    %19 = vector.broadcast %cst_18 : f32 to vector<64x64xf32>
    %20 = arith.maximumf %18, %19 : vector<64x64xf32>
    %21 = arith.truncf %20 : vector<64x64xf32> to vector<64x64xbf16>
    %c0_19 = arith.constant 0 : index
    %c0_20 = arith.constant 0 : index
    %22 = vector.load %arg5[%c0_19, %c0_20] : memref<64x128xbf16, #tpu.memory_space<vmem>>, vector<64x128xbf16>
    %cst_21 = arith.constant dense<0.000000e+00> : vector<64x128xf32>
    %23 = tpu.matmul %21, %22, %cst_21 {dimension_numbers = #tpu.dot_dimension_numbers<[1], [0], [0], [1], [0, 0, 1, 1], [], []>} : vector<64x64xbf16>, vector<64x128xbf16>, vector<64x128xf32> -> vector<64x128xf32>
    %c0_22 = arith.constant 0 : index
    %c0_23 = arith.constant 0 : index
    %24 = vector.load %arg6[%c0_22, %c0_23] : memref<1x128xf32, #tpu.memory_space<vmem>>, vector<1x128xf32>
    %25 = vector.broadcast %24 : vector<1x128xf32> to vector<64x128xf32>
    %26 = arith.addf %23, %25 : vector<64x128xf32>
    %c0_24 = arith.constant 0 : index
    %c0_25 = arith.constant 0 : index
    %27 = vector.load %arg7[%c0_24, %c0_25] : memref<64x128xf32, #tpu.memory_space<vmem>>, vector<64x128xf32>
    tpu.vector_store %arg7[%c0_24, %c0_25], %26 {strides = array<i32>} : memref<64x128xf32, #tpu.memory_space<vmem>>, vector<64x128xf32>,
    return
  }
  func.func @transform_0(%arg0: i32) -> (i32, i32) {
    %c0_i32 = arith.constant 0 : i32
    %c0_i32_0 = arith.constant 0 : i32
    return %arg0, %c0_i32 : i32, i32
  }
  func.func @transform_1(%arg0: i32) -> (i32, i32) {
    %c0_i32 = arith.constant 0 : i32
    %c0_i32_0 = arith.constant 0 : i32
    %c0_i32_1 = arith.constant 0 : i32
    return %c0_i32, %c0_i32_0 : i32, i32
  }
  func.func @transform_2(%arg0: i32) -> (i32, i32) {
    %c0_i32 = arith.constant 0 : i32
    %c0_i32_0 = arith.constant 0 : i32
    %c0_i32_1 = arith.constant 0 : i32
    return %c0_i32, %c0_i32_0 : i32, i32
  }
  func.func @transform_3(%arg0: i32) -> (i32, i32) {
    %c0_i32 = arith.constant 0 : i32
    %c0_i32_0 = arith.constant 0 : i32
    %c0_i32_1 = arith.constant 0 : i32
    return %c0_i32, %c0_i32_0 : i32, i32
  }
  func.func @transform_4(%arg0: i32) -> (i32, i32) {
    %c0_i32 = arith.constant 0 : i32
    %c0_i32_0 = arith.constant 0 : i32
    %c0_i32_1 = arith.constant 0 : i32
    return %c0_i32, %c0_i32_0 : i32, i32
  }
  func.func @transform_5(%arg0: i32) -> (i32, i32) {
    %c0_i32 = arith.constant 0 : i32
    %c0_i32_0 = arith.constant 0 : i32
    %c0_i32_1 = arith.constant 0 : i32
    return %c0_i32, %c0_i32_0 : i32, i32
  }
  func.func @transform_6(%arg0: i32) -> (i32, i32) {
    %c0_i32 = arith.constant 0 : i32
    %c0_i32_0 = arith.constant 0 : i32
    return %arg0, %c0_i32 : i32, i32
  }
}

</mosaic_0001>

<bundles_post_ra>
// kernel: encoder_forward.1
= control target key start
LH: loop header
LB: loop body
LE: loop exit
PB: predicated region body
PF: predicated region fallthrough
CT: control target
= control target key end

     0   :  { %v1030_v48 = vmov 0   ;;  %vm265_vm0 = vcmask 1044480   ;;  %vm181_vm1 = vsmask.f32 7424  ;;  %vm228_vm2 = vsmask.f32 5376  ;;  %s1298_s1 = inlined_call_operand.vmem [shape: f32[128,128], index: 1, kind: input, shape index: {}]   ;;  %s1299_s2 = inlined_call_operand.vmem [shape: bf16[512,64], index: 2, kind: input, shape index: {}]   ;;  %s1300_s0 = inlined_call_operand.vmem [shape: f32[64,128], index: 0, kind: input, shape index: {}]   ;;  %s1301_s3 = inlined_call_operand.vmem [shape: f32[1,64], index: 3, kind: input, shape index: {}]   ;;  %s1302_s5 = inlined_call_operand.vmem [shape: f32[1,128], index: 5, kind: input, shape index: {}]   ;;  %s1303_s4 = inlined_call_operand.vmem [shape: bf16[64,128], index: 4, kind: input, shape index: {}]   ;;  %s1304_s6 = inlined_call_operand.vmem [shape: f32[64,128], index: 6, kind: output, shape index: {}]  }
   0x1   :  { %v48_v0 = vld [vmem:[%s1298_s1 + $0x78] sm:$0xff]  ;;  %v47_v1 = vld [vmem:[%s1298_s1 + $0x70] sm:$0xff]  ;;  %v46_v2 = vld [vmem:[%s1298_s1 + $0x68] sm:$0xff]  ;;  %24 = vst [vmem:[#allocation2 + $0x20] sm:$0xf] %v1030_v48  ;;  %vm703_vm3 = vcmask 523264  }
   0x2   :  { %49 = vmatpush.msra.mxu0 %v48_v0  ;;  %1003 = vmatpush.msra.mxu2 %v48_v0  ;;  %v45_v3 = vld [vmem:[%s1298_s1 + $0x60] sm:$0xff]  ;;  %v44_v4 = vld [vmem:[%s1298_s1 + $0x58] sm:$0xff]  ;;  %v43_v5 = vld [vmem:[%s1298_s1 + $0x50] sm:$0xff] }
   0x3   :  { %v42_v6 = vld [vmem:[%s1298_s1 + $0x48] sm:$0xff]  ;;  %v41_v7 = vld [vmem:[%s1298_s1 + $0x40] sm:$0xff]  ;;  %v40_v8 = vld [vmem:[%s1298_s1 + $0x38] sm:$0xff] }
   0x4   :  { %50 = vmatpush.msra.mxu0 %v47_v1  ;;  %1004 = vmatpush.msra.mxu2 %v47_v1  ;;  %v39_v9 = vld [vmem:[%s1298_s1 + $0x30] sm:$0xff]  ;;  %v38_v10 = vld [vmem:[%s1298_s1 + $0x28] sm:$0xff]  ;;  %v37_v11 = vld [vmem:[%s1298_s1 + $0x20] sm:$0xff] }
   0x5   :  { %v36_v12 = vld [vmem:[%s1298_s1 + $0x18] sm:$0xff]  ;;  %v35_v13 = vld [vmem:[%s1298_s1 + $0x10] sm:$0xff]  ;;  %v34_v15 = vld [vmem:[%s1298_s1 + $0x8] sm:$0xff] }
   0x6   :  { %51 = vmatpush.msra.mxu0 %v46_v2  ;;  %1005 = vmatpush.msra.mxu2 %v46_v2  ;;  %v947_v14 = vld [vmem:[%s1299_s2 + $0x38] sm:$0xff]  ;;  %v946_v16 = vld [vmem:[%s1299_s2 + $0x30] sm:$0xff]  ;;  %v33_v17 = vld [vmem:[%s1298_s1] sm:$0xff] }
   0x7   :  { %539 = vmatpush.bf16.msra.mxu1 %v947_v14  ;;  %1019 = vmatpush.bf16.msra.mxu3 %v947_v14  ;;  %v25_v18 = vld [vmem:[%s1300_s0] sm:$0xff]  ;;  %v26_v20 = vld [vmem:[%s1300_s0 + $0x8] sm:$0xff]  ;;  %v27_v22 = vld [vmem:[%s1300_s0 + $0x10] sm:$0xff] }
   0x8   :  { %52 = vmatpush.msra.mxu0 %v45_v3  ;;  %1006 = vmatpush.msra.mxu2 %v45_v3  ;;  %v29_v19 = vld [vmem:[%s1300_s0 + $0x20] sm:$0xff]  ;;  %v30_v21 = vld [vmem:[%s1300_s0 + $0x28] sm:$0xff]  ;;  %v31_v23 = vld [vmem:[%s1300_s0 + $0x30] sm:$0xff] }
   0x9   :  { %v28_v24 = vld [vmem:[%s1300_s0 + $0x18] sm:$0xff]  ;;  %v945_v26 = vld [vmem:[%s1299_s2 + $0x28] sm:$0xff]  ;;  %v944_v27 = vld [vmem:[%s1299_s2 + $0x20] sm:$0xff] }
   0xa   :  { %53 = vmatpush.msra.mxu0 %v44_v4  ;;  %1007 = vmatpush.msra.mxu2 %v44_v4  ;;  %v32_v25 = vld [vmem:[%s1300_s0 + $0x38] sm:$0xff]  ;;  %v942_v30 = vld [vmem:[%s1299_s2 + $0x10] sm:$0xff]  ;;  %v941_v33 = vld [vmem:[%s1299_s2 + $0x8] sm:$0xff] }
   0xb   :  { %540 = vmatpush.bf16.msra.mxu1 %v946_v16  ;;  %1020 = vmatpush.bf16.msra.mxu3 %v946_v16  ;;  %v943_v28 = vld [vmem:[%s1299_s2 + $0x18] sm:$0xff]  ;;  %v970_v32 = vld [vmem:[%s1299_s2 + $0xf0] sm:$0xff]  ;;  %v969_v35 = vld [vmem:[%s1299_s2 + $0xe8] sm:$0xff] }
   0xc   :  { %54 = vmatpush.msra.mxu0 %v43_v5  ;;  %1008 = vmatpush.msra.mxu2 %v43_v5  ;;  %v971_v29 = vld [vmem:[%s1299_s2 + $0xf8] sm:$0xff]  ;;  %v954_v34 = vld [vmem:[%s1299_s2 + $0x70] sm:$0xff]  ;;  %v940_v36 = vld [vmem:[%s1299_s2] sm:$0xff] }
   0xd   :  { %v955_v31 = vld [vmem:[%s1299_s2 + $0x78] sm:$0xff]  ;;  %v953_v37 = vld [vmem:[%s1299_s2 + $0x68] sm:$0xff]  ;;  %v968_v38 = vld [vmem:[%s1299_s2 + $0xe0] sm:$0xff] }
   0xe   :  { %55 = vmatpush.msra.mxu0 %v42_v6  ;;  %1009 = vmatpush.msra.mxu2 %v42_v6  ;;  %v952_v39 = vld [vmem:[%s1299_s2 + $0x60] sm:$0xff]  ;;  %v967_v40 = vld [vmem:[%s1299_s2 + $0xd8] sm:$0xff]  ;;  %v966_v43 = vld [vmem:[%s1299_s2 + $0xd0] sm:$0xff] }
   0xf   :  { %541 = vmatpush.bf16.msra.mxu1 %v945_v26  ;;  %1021 = vmatpush.bf16.msra.mxu3 %v945_v26  ;;  %v951_v41 = vld [vmem:[%s1299_s2 + $0x58] sm:$0xff]  ;;  %v950_v44 = vld [vmem:[%s1299_s2 + $0x50] sm:$0xff]  ;;  %v965_v47 = vld [vmem:[%s1299_s2 + $0xc8] sm:$0xff] }
  0x10   :  { %56 = vmatpush.msra.mxu0 %v41_v7  ;;  %1010 = vmatpush.msra.mxu2 %v41_v7  ;;  %v963_v42 = vld [vmem:[%s1299_s2 + $0xb8] sm:$0xff]  ;;  %v962_v45 = vld [vmem:[%s1299_s2 + $0xb0] sm:$0xff]  ;;  %v949_v49 = vld [vmem:[%s1299_s2 + $0x48] sm:$0xff] }
  0x11   :  { %v961_v50 = vld [vmem:[%s1299_s2 + $0xa8] sm:$0xff]  ;;  %v964_v51 = vld [vmem:[%s1299_s2 + $0xc0] sm:$0xff]  ;;  %v959_v59 = vld [vmem:[%s1299_s2 + $0x98] sm:$0xff] }
  0x12   :  { %57 = vmatpush.msra.mxu0 %v40_v8  ;;  %1011 = vmatpush.msra.mxu2 %v40_v8  ;;  %v948_v53 = vld [vmem:[%s1299_s2 + $0x40] sm:$0xff]  ;;  %v958_v60 = vld [vmem:[%s1299_s2 + $0x90] sm:$0xff]  ;;  %v957_v2 = vld [vmem:[%s1299_s2 + $0x88] sm:$0xff] }
  0x13   :  { %542 = vmatpush.bf16.msra.mxu1 %v944_v27  ;;  %1022 = vmatpush.bf16.msra.mxu3 %v944_v27  ;;  %v960_v54 = vld [vmem:[%s1299_s2 + $0xa0] sm:$0xff] }
  0x14   :  { %58 = vmatpush.msra.mxu0 %v39_v9  ;;  %1012 = vmatpush.msra.mxu2 %v39_v9  ;;  %v956_v4 = vld [vmem:[%s1299_s2 + $0x80] sm:$0xff] }
  0x16   :  { %59 = vmatpush.msra.mxu0 %v38_v10  ;;  %1013 = vmatpush.msra.mxu2 %v38_v10 }
  0x17   :  { %543 = vmatpush.bf16.msra.mxu1 %v943_v28  ;;  %1023 = vmatpush.bf16.msra.mxu3 %v943_v28 }
  0x18   :  { %60 = vmatpush.msra.mxu0 %v37_v11  ;;  %1014 = vmatpush.msra.mxu2 %v37_v11 }
  0x1a   :  { %61 = vmatpush.msra.mxu0 %v36_v12  ;;  %1015 = vmatpush.msra.mxu2 %v36_v12 }
  0x1b   :  { %544 = vmatpush.bf16.msra.mxu1 %v942_v30  ;;  %1024 = vmatpush.bf16.msra.mxu3 %v942_v30 }
  0x1c   :  { %62 = vmatpush.msra.mxu0 %v35_v13  ;;  %1016 = vmatpush.msra.mxu2 %v35_v13 }
  0x1e   :  { %63 = vmatpush.msra.mxu0 %v34_v15  ;;  %1017 = vmatpush.msra.mxu2 %v34_v15 }
  0x1f   :  { %545 = vmatpush.bf16.msra.mxu1 %v941_v33  ;;  %1025 = vmatpush.bf16.msra.mxu3 %v941_v33 }
  0x20   :  { %64 = vmatpush.msra.mxu0 %v33_v17  ;;  %1018 = vmatpush.msra.mxu2 %v33_v17 }
  0x21   :  { %65 = vmatmul.f32.vlgmr.msra.gmra.mxu0 %v25_v18  ;;  %77 = vmatmul.f32.vlgmr.msra.gmra.mxu2 %v29_v19 }
  0x22   :  { %626 = vmatpush.bf16.msrb.mxu0 %v971_v29  ;;  %568 = vmatpush.bf16.msrb.mxu2 %v955_v31 }
  0x23   :  { %546 = vmatpush.bf16.msra.mxu1 %v940_v36  ;;  %1026 = vmatpush.bf16.msra.mxu3 %v940_v36 }
  0x26   :  { %627 = vmatpush.bf16.msrb.mxu0 %v970_v32  ;;  %569 = vmatpush.bf16.msrb.mxu2 %v954_v34 }
  0x27   :  { %597 = vmatpush.bf16.msrb.mxu3 %v963_v42 }
  0x29   :  { %68 = vmatmul.f32.gmra.mxu0 %v26_v20  ;;  %80 = vmatmul.f32.gmra.mxu2 %v30_v21 }
  0x2a   :  { %628 = vmatpush.bf16.msrb.mxu0 %v969_v35  ;;  %570 = vmatpush.bf16.msrb.mxu2 %v953_v37 }
  0x2b   :  { %598 = vmatpush.bf16.msrb.mxu3 %v962_v45 }
  0x2e   :  { %629 = vmatpush.bf16.msrb.mxu0 %v968_v38  ;;  %571 = vmatpush.bf16.msrb.mxu2 %v952_v39 }
  0x2f   :  { %599 = vmatpush.bf16.msrb.mxu3 %v961_v50 }
  0x31   :  { %71 = vmatmul.f32.gmra.mxu0 %v27_v22  ;;  %83 = vmatmul.f32.gmra.mxu2 %v31_v23 }
  0x32   :  { %630 = vmatpush.bf16.msrb.mxu0 %v967_v40  ;;  %572 = vmatpush.bf16.msrb.mxu2 %v951_v41 }
  0x33   :  { %600 = vmatpush.bf16.msrb.mxu3 %v960_v54 }
  0x36   :  { %631 = vmatpush.bf16.msrb.mxu0 %v966_v43  ;;  %573 = vmatpush.bf16.msrb.mxu2 %v950_v44 }
  0x37   :  { %601 = vmatpush.bf16.msrb.mxu3 %v959_v59  ;;  %v130_v59 = vld [vmem:[#allocation2 + $0x20] sm:$0x1] }
  0x39   :  { %74 = vmatmul.f32.gmra.mxu0 %v28_v24  ;;  %86 = vmatmul.f32.gmra.mxu2 %v32_v25 }
  0x3a   :  { %632 = vmatpush.bf16.msrb.mxu0 %v965_v47  ;;  %574 = vmatpush.bf16.msrb.mxu2 %v949_v49 }
  0x3b   :  { %602 = vmatpush.bf16.msrb.mxu3 %v958_v60 }
  0x3e   :  { %633 = vmatpush.bf16.msrb.mxu0 %v964_v51  ;;  %575 = vmatpush.bf16.msrb.mxu2 %v948_v53 }
  0x3f   :  { %603 = vmatpush.bf16.msrb.mxu3 %v957_v2 }
  0x43   :  { %604 = vmatpush.bf16.msrb.mxu3 %v956_v4 }
  0x9e   :  { %v66_v46 = vpop.f32.mrf.mxu0 }
  0x9f   :  { %v90_v55 = vmax.f32 %v66_v46, 0.0 }
  0xa4   :  { %v78_v52 = vpop.f32.mrf.mxu2 }
  0xa5   :  { %v94_v62 = vmax.f32 %v78_v52, 0.0 }
  0xa6   :  { %v69_v56 = vpop.f32.mrf.mxu0 }
  0xa7   :  { %v91_v57 = vmax.f32 %v69_v56, 0.0 }
  0xa9   :  { %v979_v58 = vpack.c.bf16 %v91_v57, %v90_v55 }
  0xab   :  { %980 = vst [vmem:[#allocation2] sm:$0xff] %v979_v58   ;;  %v999_v13 = vunpack.c.h.b16 %v979_v58  ;;  %v185_v17 = vshll.u32 %v979_v58, 16  ;;  %v183_v22 = vshrl.u32 %v979_v58, 16 }
  0xac   :  { %v81_v61 = vpop.f32.mrf.mxu2 }
  0xad   :  { %v95_v63 = vmax.f32 %v81_v61, 0.0  ;;  %v187_v23 = vrot.slane %v185_v17, 1 }
  0xae   :  { %v72_v0 = vpop.f32.mrf.mxu0 }
  0xaf   :  { %v989_v1 = vpack.c.bf16 %v95_v63, %v94_v62  ;;  %v92_v6 = vmax.f32 %v72_v0, 0.0  ;;  %v188_v29 = vor.u32 %v187_v23, %v183_v22  ;;  %v132_v63 = vld [vmem:[#allocation2 + $0x20] sm:$0x7]  ;;  %v975_v23 = vld [vmem:[%s1303_s4 + $0x18] sm:$0xff] }
  0xb0   :  { %720 = vmatpush.bf16.msrb.mxu1 %v975_v23 }
  0xb1   :  { %1001 = vst [vmem:[#allocation2 + $0x10] sm:$0xff] %v989_v1   ;;  %v175_v1 = vunpack.c.l.b16 %v130_v59 }
  0xb2   :  { %v933_v3 = vld [vmem:[#allocation2] sm:$0xff] }
  0xb3   :  { %547 = vmatmul.bf16.vlgmr.msra.gmra.mxu1 %v933_v3  ;;  %v133_v11 = vld [vmem:[#allocation2] sm:$0x8]  ;;  %v225_v3 = vunpack.c.l.b16 %v132_v63  ;;  %v180_v4 = vpack.c.b16 %v175_v1, %v175_v1 }
  0xb4   :  { %v84_v5 = vpop.f32.mrf.mxu2  ;;  %v263_v14 = vunpack.c.l.b16 %v133_v11  ;;  %v131_v27 = vld [vmem:[#allocation2] sm:$0xc] }
  0xb5   :  { %v96_v15 = vmax.f32 %v84_v5, 0.0  ;;  %v224_v31 = vunpack.c.l.b16 %v131_v27 }
  0xb6   :  { %v75_v7 = vpop.f32.mrf.mxu0  ;;  %v264_v19 = vpack.c.b16 %v999_v13, %v263_v14 }
  0xb7   :  { %v93_v8 = vmax.f32 %v75_v7, 0.0  ;;  %v226_v34 = vpack.c.b16 %v999_v13, %v224_v31  ;;  %v214_v7 = vshll.u32 %v180_v4, 16 }
  0xb8   :  { %v935_v9 = vld [vmem:[#allocation2 + $0x10] sm:$0xff]  ;;  %v266_v24 = vrot.slane %v264_v19, 3 }
  0xb9   :  { %v984_v10 = vpack.c.bf16 %v93_v8, %v92_v6  ;;  %557 = vmatmul.bf16.vlgmr.msra.gmra.mxu3 %v935_v9  ;;  %v938_v36 = vld [vmem:[#allocation2 + $0x10] sm:$0xff]  ;;  %v230_v37 = vshrl.u32 %v226_v34, 16  ;;  %v233_v38 = vshll.u32 %v226_v34, 16  ;;  %v227_v6 = vpack.c.b16 %v225_v3, %v225_v3 }
  0xba   :  { %v198_v41 = vshll.u32 %v938_v36, 16  ;;  %v269_v44 = vrot.slane %v938_v36, 3  ;;  %v202_v53 = vshrl.u32 %v938_v36, 16 }
  0xbb   :  { %1000 = vst [vmem:[#allocation2 + $0x8] sm:$0xff] %v984_v10   ;;  %v232_v42 = vrot.slane %v230_v37, 2  ;;  %v235_v43 = vrot.slane %v233_v38, 3  ;;  %v273_v10 = vrot.slane %v227_v6, 3  ;;  %v250_v17 = vshrl.u32 %v227_v6, 16 }
  0xbc   :  { %v87_v12 = vpop.f32.mrf.mxu2  ;;  %v200_v48 = vrot.slane %v198_v41, 1  ;;  %v241_v56 = vrot.slane %v202_v53, 2  ;;  %v242_v57 = vrot.slane %v198_v41, 3 }
  0xbd   :  { %v97_v16 = vmax.f32 %v87_v12, 0.0  ;;  %v236_v49 = vor.u32 %v235_v43, %v232_v42  ;;  %v216_v12 = vrot.slane %v214_v7, 1  ;;  %v252_v19 = vrot.slane %v250_v17, 2 }
  0xbe   :  { %v204_v61 = vor.u32 %v202_v53, %v200_v48  ;;  %v243_v62 = vor.u32 %v242_v57, %v241_v56 }
  0xbf   :  { %v994_v18 = vpack.c.bf16 %v97_v16, %v96_v15 }
  0xc1   :  { %1002 = vst [vmem:[#allocation2 + $0x18] sm:$0xff] %v994_v18   ;;  %v253_v18 = vshll.u32 %v227_v6, 16 }
  0xc2   :  { %v934_v20 = vld [vmem:[#allocation2 + $0x8] sm:$0xff] }
  0xc3   :  { %v937_v21 = vld [vmem:[#allocation2 + $0x8] sm:$0xff]  ;;  %552 = vmatmul.bf16.gmra.mxu1 %v934_v20  ;;  %v255_v20 = vrot.slane %v253_v18, 3 }
  0xc4   :  { %v267_v25 = vrot.slane %v937_v21, 3  ;;  %v190_v26 = vshll.u32 %v937_v21, 16  ;;  %v194_v35 = vshrl.u32 %v937_v21, 16 }
  0xc5   :  { %v256_v21 = vor.u32 %v255_v20, %v252_v19 }
  0xc6   :  { %v268_v28 = vsel %vm265_vm0, %v266_v24, %v267_v25  ;;  %v192_v30 = vrot.slane %v190_v26, 1  ;;  %v237_v39 = vrot.slane %v194_v35, 2  ;;  %v238_v40 = vrot.slane %v190_v26, 3  ;;  %v974_v24 = vld [vmem:[%s1303_s4 + $0x10] sm:$0xff]  ;;  %v973_v26 = vld [vmem:[%s1303_s4 + $0x8] sm:$0xff] }
  0xc7   :  { %634 = vmatmul.bf16.vlgmr.msrb.gmra.mxu0 %v268_v28  ;;  %v270_v47 = vsel %vm265_vm0, %v267_v25, %v269_v44  ;;  %721 = vmatpush.bf16.msrb.mxu1 %v974_v24  ;;  %v972_v28 = vld [vmem:[%s1303_s4] sm:$0xff] }
  0xc8   :  { %v193_v32 = vsel %vm181_vm1, %v188_v29, %v192_v30  ;;  %v936_v33 = vld [vmem:[#allocation2 + $0x18] sm:$0xff]  ;;  %v196_v45 = vor.u32 %v194_v35, %v192_v30  ;;  %v239_v46 = vor.u32 %v238_v40, %v237_v39  ;;  %v1028_v35 = vld [vmem:[%s1301_s3] ss:$0 sm:$0xff] }
  0xc9   :  { %576 = vmatmul.bf16.vlgmr.msrb.gmra.mxu2 %v193_v32  ;;  %562 = vmatmul.bf16.gmra.mxu3 %v936_v33  ;;  %v939_v52 = vld [vmem:[#allocation2 + $0x18] sm:$0xff] }
  0xca   :  { %v201_v50 = vsel %vm181_vm1, %v196_v45, %v200_v48  ;;  %v240_v51 = vsel %vm228_vm2, %v236_v49, %v239_v46  ;;  %v206_v54 = vshll.u32 %v939_v52, 16  ;;  %v271_v55 = vrot.slane %v939_v52, 3 }
  0xcb   :  { %v244_v2 = vsel %vm228_vm2, %v239_v46, %v243_v62  ;;  %v210_v5 = vshrl.u32 %v939_v52, 16  ;;  %722 = vmatpush.bf16.msrb.mxu1 %v973_v26 }
  0xcc   :  { %v208_v58 = vrot.slane %v206_v54, 1  ;;  %v272_v60 = vsel %vm265_vm0, %v269_v44, %v271_v55  ;;  %v246_v9 = vrot.slane %v206_v54, 3  ;;  %v274_v14 = vsel %vm265_vm0, %v271_v55, %v273_v10 }
  0xcd   :  { %v245_v8 = vrot.slane %v210_v5, 2 }
  0xce   :  { %v209_v0 = vsel %vm181_vm1, %v204_v61, %v208_v58  ;;  %v212_v11 = vor.u32 %v210_v5, %v208_v58 }
  0xcf   :  { %v247_v13 = vor.u32 %v246_v9, %v245_v8  ;;  %723 = vmatpush.bf16.msrb.mxu1 %v972_v28 }
  0xd0   :  { %v217_v15 = vsel %vm181_vm1, %v212_v11, %v216_v12 }
  0xd1   :  { %v248_v16 = vsel %vm228_vm2, %v243_v62, %v247_v13  ;;  %v257_v22 = vsel %vm228_vm2, %v247_v13, %v256_v21 }
  0xd7   :  { %639 = vmatmul.bf16.gmra.mxu0 %v270_v47 }
  0xd9   :  { %581 = vmatmul.bf16.gmra.mxu2 %v201_v50  ;;  %605 = vmatmul.bf16.vlgmr.msrb.gmra.mxu3 %v240_v51 }
  0xe7   :  { %644 = vmatmul.bf16.gmra.mxu0 %v272_v60 }
  0xe9   :  { %586 = vmatmul.bf16.gmra.mxu2 %v209_v0  ;;  %610 = vmatmul.bf16.gmra.mxu3 %v244_v2 }
  0xf7   :  { %649 = vmatmul.bf16.gmra.mxu0 %v274_v14 }
  0xf9   :  { %591 = vmatmul.bf16.gmra.mxu2 %v217_v15  ;;  %615 = vmatmul.bf16.gmra.mxu3 %v248_v16 }
 0x109   :  { %620 = vmatmul.bf16.gmra.mxu3 %v257_v22 }
 0x130   :  { %v548_v31 = vpop.f32.mrf.mxu1 }
 0x131   :  { %v549_v39 = vadd.f32 %v1028_v35, %v548_v31 }
 0x138   :  { %v550_v36 = vpop.f32.mrf.mxu1 }
 0x139   :  { %v551_v42 = vadd.f32 %v1028_v35, %v550_v36 }
 0x13c   :  { %v558_v25 = vpop.f32.mrf.mxu3 }
 0x13d   :  { %v559_v10 = vadd.f32 %v1028_v35, %v558_v25 }
 0x140   :  { %v553_v44 = vpop.f32.mrf.mxu1 }
 0x141   :  { %v554_v56 = vadd.f32 %v1028_v35, %v553_v44 }
 0x144   :  { %v560_v27 = vpop.f32.mrf.mxu3  ;;  %v635_v32 = vpop.f32.mrf.mxu0 }
 0x145   :  { %v561_v12 = vadd.f32 %v1028_v35, %v560_v27 }
 0x148   :  { %v555_v57 = vpop.f32.mrf.mxu1 }
 0x149   :  { %v556_v60 = vadd.f32 %v1028_v35, %v555_v57 }
 0x14c   :  { %v577_v29 = vpop.f32.mrf.mxu2  ;;  %v1258_v30 = vpop.f32.mrf.mxu3 }
 0x14d   :  { %v637_v37 = vpop.f32.mrf.mxu0  ;;  %v578_v41 = vadd.f32 %v577_v29, %v549_v39  ;;  %v564_v28 = vadd.f32 %v1028_v35, %v1258_v30  ;;  %v1029_v30 = vld [vmem:[%s1302_s5] ss:$0 sm:$0xff] }
 0x154   :  { %v579_v33 = vpop.f32.mrf.mxu2  ;;  %v1260_v34 = vpop.f32.mrf.mxu3 }
 0x155   :  { %v580_v45 = vadd.f32 %v579_v33, %v551_v42  ;;  %v640_v46 = vpop.f32.mrf.mxu0  ;;  %v566_v27 = vadd.f32 %v1028_v35, %v1260_v34 }
 0x15c   :  { %v606_v38 = vpop.f32.mrf.mxu3  ;;  %v582_v40 = vpop.f32.mrf.mxu2 }
 0x15d   :  { %v607_v43 = vadd.f32 %v606_v38, %v578_v41  ;;  %v642_v58 = vpop.f32.mrf.mxu0  ;;  %v583_v59 = vadd.f32 %v582_v40, %v554_v56 }
 0x15f   :  { %v636_v48 = vadd.f32 %v635_v32, %v607_v43 }
 0x161   :  { %v655_v52 = vmax.f32 %v636_v48, 0.0 }
 0x164   :  { %v608_v47 = vpop.f32.mrf.mxu3  ;;  %v584_v51 = vpop.f32.mrf.mxu2 }
 0x165   :  { %v609_v49 = vadd.f32 %v608_v47, %v580_v45  ;;  %v585_v63 = vadd.f32 %v584_v51, %v556_v60  ;;  %v645_v4 = vpop.f32.mrf.mxu0 }
 0x167   :  { %v638_v50 = vadd.f32 %v637_v37, %v609_v49 }
 0x169   :  { %v656_v53 = vmax.f32 %v638_v50, 0.0 }
 0x16b   :  { %v663_v54 = vpack.c.bf16 %v656_v53, %v655_v52 }
 0x16c   :  { %v611_v55 = vpop.f32.mrf.mxu3  ;;  %v587_v62 = vpop.f32.mrf.mxu2 }
 0x16d   :  { %929 = vmatmul.msk.bf16.vlgmr.msrb.gmra.mxu1 %vm703_vm3, %v663_v54  ;;  %v612_v61 = vadd.f32 %v611_v55, %v583_v59  ;;  %v588_v11 = vadd.f32 %v587_v62, %v559_v10  ;;  %v647_v14 = vpop.f32.mrf.mxu0 }
 0x16f   :  { %v641_v1 = vadd.f32 %v640_v46, %v612_v61 }
 0x171   :  { %v657_v5 = vmax.f32 %v641_v1, 0.0 }
 0x174   :  { %v613_v0 = vpop.f32.mrf.mxu3  ;;  %v589_v8 = vpop.f32.mrf.mxu2 }
 0x175   :  { %v614_v2 = vadd.f32 %v613_v0, %v585_v63  ;;  %v590_v15 = vadd.f32 %v589_v8, %v561_v12  ;;  %v650_v24 = vpop.f32.mrf.mxu0 }
 0x177   :  { %v643_v3 = vadd.f32 %v642_v58, %v614_v2 }
 0x179   :  { %v658_v6 = vmax.f32 %v643_v3, 0.0 }
 0x17b   :  { %v664_v7 = vpack.c.bf16 %v658_v6, %v657_v5 }
 0x17c   :  { %v616_v9 = vpop.f32.mrf.mxu3  ;;  %v592_v19 = vpop.f32.mrf.mxu2 }
 0x17d   :  { %930 = vmatmul.msk.bf16.gmra.mxu1 %vm703_vm3, %v664_v7  ;;  %v617_v13 = vadd.f32 %v616_v9, %v588_v11  ;;  %v593_v25 = vadd.f32 %v592_v19, %v564_v28  ;;  %v652_v38 = vpop.f32.mrf.mxu0 }
 0x17f   :  { %v646_v17 = vadd.f32 %v645_v4, %v617_v13 }
 0x181   :  { %v659_v21 = vmax.f32 %v646_v17, 0.0 }
 0x184   :  { %v618_v16 = vpop.f32.mrf.mxu3  ;;  %v594_v29 = vpop.f32.mrf.mxu2 }
 0x185   :  { %v619_v18 = vadd.f32 %v618_v16, %v590_v15  ;;  %v595_v32 = vadd.f32 %v594_v29, %v566_v27 }
 0x187   :  { %v648_v20 = vadd.f32 %v647_v14, %v619_v18 }
 0x189   :  { %v660_v22 = vmax.f32 %v648_v20, 0.0 }
 0x18b   :  { %v665_v23 = vpack.c.bf16 %v660_v22, %v659_v21 }
 0x18c   :  { %v621_v26 = vpop.f32.mrf.mxu3 }
 0x18d   :  { %931 = vmatmul.msk.bf16.gmra.mxu1 %vm703_vm3, %v665_v23  ;;  %v622_v31 = vadd.f32 %v621_v26, %v593_v25 }
 0x18f   :  { %v651_v36 = vadd.f32 %v650_v24, %v622_v31 }
 0x191   :  { %v661_v40 = vmax.f32 %v651_v36, 0.0 }
 0x194   :  { %v623_v33 = vpop.f32.mrf.mxu3 }
 0x195   :  { %v624_v37 = vadd.f32 %v623_v33, %v595_v32 }
 0x197   :  { %v653_v39 = vadd.f32 %v652_v38, %v624_v37 }
 0x199   :  { %v662_v41 = vmax.f32 %v653_v39, 0.0 }
 0x19b   :  { %v666_v42 = vpack.c.bf16 %v662_v41, %v661_v40 }
 0x19d   :  { %932 = vmatmul.msk.bf16.gmra.mxu1 %vm703_vm3, %v666_v42 }
 0x1ea   :  { %v725_v43 = vpop.f32.mrf.mxu1 }
 0x1eb   :  { %v726_v44 = vadd.f32 %v1029_v30, %v725_v43 }
 0x1ed   :  { %745 = vst [vmem:[%s1304_s6] sm:$0xff] %v726_v44 }
 0x1f2   :  { %v727_v34 = vpop.f32.mrf.mxu1 }
 0x1f3   :  { %v728_v35 = vadd.f32 %v1029_v30, %v727_v34 }
 0x1f5   :  { %746 = vst [vmem:[%s1304_s6 + $0x8] sm:$0xff] %v728_v35 }
 0x1fa   :  { %v730_v45 = vpop.f32.mrf.mxu1 }
 0x1fb   :  { %v731_v46 = vadd.f32 %v1029_v30, %v730_v45 }
 0x1fd   :  { %747 = vst [vmem:[%s1304_s6 + $0x10] sm:$0xff] %v731_v46 }
 0x202   :  { %v732_v47 = vpop.f32.mrf.mxu1 }
 0x203   :  { %v733_v48 = vadd.f32 %v1029_v30, %v732_v47 }
 0x205   :  { %748 = vst [vmem:[%s1304_s6 + $0x18] sm:$0xff] %v733_v48 }
 0x20a   :  { %v735_v49 = vpop.f32.mrf.mxu1 }
 0x20b   :  { %v736_v50 = vadd.f32 %v1029_v30, %v735_v49 }
 0x20d   :  { %749 = vst [vmem:[%s1304_s6 + $0x20] sm:$0xff] %v736_v50 }
 0x212   :  { %v737_v51 = vpop.f32.mrf.mxu1 }
 0x213   :  { %v738_v52 = vadd.f32 %v1029_v30, %v737_v51 }
 0x215   :  { %750 = vst [vmem:[%s1304_s6 + $0x28] sm:$0xff] %v738_v52 }
 0x21a   :  { %v740_v53 = vpop.f32.mrf.mxu1 }
 0x21b   :  { %v741_v54 = vadd.f32 %v1029_v30, %v740_v53 }
 0x21d   :  { %751 = vst [vmem:[%s1304_s6 + $0x30] sm:$0xff] %v741_v54 }
 0x222   :  { %v742_v55 = vpop.f32.mrf.mxu1 }
 0x223   :  { %v743_v56 = vadd.f32 %v1029_v30, %v742_v55 }
 0x225   :  { %752 = vst [vmem:[%s1304_s6 + $0x38] sm:$0xff] %v743_v56 }

</bundles_post_ra>
